<compile_context>
chip_gen: v7x
topology: tpu7x:2x2x1
jax: 0.10.0
libtpu: 0.0.40
codegen_flags: <defaults>
</compile_context>

<pallas_src>
import math

import jax
import jax.numpy as jnp
from jax.experimental import pallas as pl
from jax.experimental.pallas import tpu as pltpu

HIDDEN = 768          # BERT hidden size (lin1 input dim)
SEQ = 768             # forced by the literal forward: embs[0].T[0] must be 768-long
BATCH = 2
D1 = 128              # lin1 out
D2 = 32               # lin2 out
NUM_CLASSES = 4       # args.num_classes


def fused_head_kernel(x_ref, w_ref, b_ref, o_ref):
    """[m_tile, 768](bf16) @ [768, C](bf16) -> f32 acc, + bias(f32) -> [m_tile, C]."""
    acc = jnp.dot(x_ref[...], w_ref[...], preferred_element_type=jnp.float32)
    o_ref[...] = (acc + b_ref[...]).astype(o_ref.dtype)


def fuse_params(params):
    """Collapse lin1 -> (dropout=identity) -> lin2 -> predict into one affine map.

    Weights are stored transposed relative to torch ([in, out]) so the kernel
    computes x @ W. No HBM-side zero padding: W is [768, C] bf16 (~6 KB),
    b is [1, C] f32 (16 B). Lane padding happens for free in VMEM.
    """
    w1, b1, w2, b2, w3, b3 = params
    w_fused = (w1 @ w2 @ w3).astype(jnp.bfloat16)            # [768, C]
    b_fused = ((b1 @ w2 + b2) @ w3 + b3).astype(jnp.float32)  # [1, C]
    return w_fused, b_fused


def cls_head_pallas(x_rows, w_fused, b_fused, *, m_tile=128):
    """x_rows: [B, 768] float. Returns [B, num_classes] float32 (all rows computed)."""
    B = x_rows.shape[0]
    if B % m_tile != 0:
        m_tile = B                      # small batch: one full-array block, grid=(1,)
    grid = (B // m_tile,)

    x_bf16 = x_rows.astype(jnp.bfloat16)   # halves activation DMA; fused with gather by XLA

    bytes_accessed = (B * HIDDEN * 2          # x (bf16)
                      + HIDDEN * NUM_CLASSES * 2   # fused W (bf16)
                      + NUM_CLASSES * 4            # fused b (f32)
                      + B * NUM_CLASSES * 4)       # out (f32)

    out = pl.pallas_call(
        fused_head_kernel,
        out_shape=jax.ShapeDtypeStruct((B, NUM_CLASSES), jnp.float32),
        grid=grid,
        in_specs=[
            pl.BlockSpec((m_tile, HIDDEN), lambda i: (i, 0)),
            pl.BlockSpec((HIDDEN, NUM_CLASSES), lambda i: (0, 0)),
            pl.BlockSpec((1, NUM_CLASSES), lambda i: (0, 0)),
        ],
        out_specs=pl.BlockSpec((m_tile, NUM_CLASSES), lambda i: (i, 0)),
        compiler_params=pltpu.CompilerParams(
            dimension_semantics=("parallel",)),   # shards row tiles across TCs on v7x
        cost_estimate=pl.CostEstimate(
            flops=2 * B * HIDDEN * NUM_CLASSES,
            transcendentals=0,
            bytes_accessed=bytes_accessed),
    )(x_bf16, w_fused, b_fused)
    return out


def cls_model_forward(embs, fused):
    """Literal ClsModel.forward: uses only batch element 0 -> [num_classes]."""
    # Column gather stays on the XLA side (cheap strided slice, ~3 KB/row).
    x_rows = embs[:, :, 0]                         # [B, 768]
    out_rows = cls_head_pallas(x_rows, *fused)     # all rows computed (free batching)
    return out_rows, out_rows[0]


def init_linear(key, fan_in, fan_out):
    """PyTorch nn.Linear default init: U(-1/sqrt(fan_in), 1/sqrt(fan_in)).

    Weight stored as [in, out] (transposed vs torch) so forward is x @ W.
    Bias stored as [1, out].
    """
    k_w, k_b = jax.random.split(key)
    bound = 1.0 / math.sqrt(fan_in)
    w = jax.random.uniform(k_w, (fan_in, fan_out), jnp.float32, -bound, bound)
    b = jax.random.uniform(k_b, (1, fan_out), jnp.float32, -bound, bound)
    return w, b


def reference_head(x_rows, params):
    """Unfused three-layer f32 reference (dropout = identity). x_rows: [B, 768]."""
    w1, b1, w2, b2, w3, b3 = params
    h = x_rows @ w1 + b1
    h = h @ w2 + b2
    return h @ w3 + b3


if __name__ == "__main__":
    root = jax.random.PRNGKey(0)
    k_emb, k1, k2, k3 = jax.random.split(root, 4)

    # Synthetic encoder output (stands in for BERT last_hidden_state), [B, S, H].
    embs = jax.random.normal(k_emb, (BATCH, SEQ, HIDDEN), jnp.float32)

    # Deterministic parameters for lin1 / lin2 / predict.
    w1, b1 = init_linear(k1, HIDDEN, D1)
    w2, b2 = init_linear(k2, D1, D2)
    w3, b3 = init_linear(k3, D2, NUM_CLASSES)
    params = (w1, b1, w2, b2, w3, b3)

    fused = fuse_params(params)
    out_rows, pred = cls_model_forward(embs, fused)
    pred = jax.block_until_ready(pred)

    ref_rows = reference_head(embs[:, :, 0], params)
    assert pred.shape == (NUM_CLASSES,)
    # bf16 operands with f32 accumulate: loosened tolerance vs. f32 reference.
    assert jnp.allclose(out_rows, ref_rows, atol=2e-2, rtol=2e-2), (out_rows, ref_rows)
    assert jnp.allclose(pred, ref_rows[0], atol=2e-2, rtol=2e-2), (pred, ref_rows[0])

    print("KERNEL_OK")
</pallas_src>

<mosaic_0001>
module attributes {stable_mosaic.version = 11 : i64} {
  func.func @fused_head_kernel(%arg0: i32, %arg1: memref<2x768xbf16, #tpu.memory_space<vmem>>, %arg2: memref<768x4xbf16, #tpu.memory_space<vmem>>, %arg3: memref<1x4xf32, #tpu.memory_space<vmem>>, %arg4: memref<2x4xf32, #tpu.memory_space<vmem>>) attributes {dimension_semantics = [#tpu.dimension_semantics<parallel>], iteration_bounds = array<i64: 1>, scalar_prefetch = 0 : i64, scratch_operands = 0 : i64, tpu.core_type = #tpu.core_type<tc>, window_params = [{transform_indices = @transform_0, window_bounds = array<i64: 2, 768>}, {pipeline_mode = #tpu.pipeline_mode<synchronous>, transform_indices = @transform_1, window_bounds = array<i64: 768, 4>}, {pipeline_mode = #tpu.pipeline_mode<synchronous>, transform_indices = @transform_2, window_bounds = array<i64: 1, 4>}, {transform_indices = @transform_3, window_bounds = array<i64: 2, 4>}]} {
    %c0 = arith.constant 0 : index
    %c0_0 = arith.constant 0 : index
    %0 = vector.load %arg1[%c0, %c0_0] : memref<2x768xbf16, #tpu.memory_space<vmem>>, vector<2x768xbf16>
    %c0_1 = arith.constant 0 : index
    %c0_2 = arith.constant 0 : index
    %1 = vector.load %arg2[%c0_1, %c0_2] : memref<768x4xbf16, #tpu.memory_space<vmem>>, vector<768x4xbf16>
    %cst = arith.constant dense<0.000000e+00> : vector<2x4xf32>
    %2 = tpu.matmul %0, %1, %cst {dimension_numbers = #tpu.dot_dimension_numbers<[1], [0], [0], [1], [0, 0, 1, 1], [], []>} : vector<2x768xbf16>, vector<768x4xbf16>, vector<2x4xf32> -> vector<2x4xf32>
    %c0_3 = arith.constant 0 : index
    %c0_4 = arith.constant 0 : index
    %3 = vector.load %arg3[%c0_3, %c0_4] : memref<1x4xf32, #tpu.memory_space<vmem>>, vector<1x4xf32>
    %4 = vector.broadcast %3 : vector<1x4xf32> to vector<2x4xf32>
    %5 = arith.addf %2, %4 : vector<2x4xf32>
    %c0_5 = arith.constant 0 : index
    %c0_6 = arith.constant 0 : index
    %6 = vector.load %arg4[%c0_5, %c0_6] : memref<2x4xf32, #tpu.memory_space<vmem>>, vector<2x4xf32>
    tpu.vector_store %arg4[%c0_5, %c0_6], %5 {strides = array<i32>} : memref<2x4xf32, #tpu.memory_space<vmem>>, vector<2x4xf32>,
    return
  }
  func.func @transform_0(%arg0: i32) -> (i32, i32) {
    %c0_i32 = arith.constant 0 : i32
    %c0_i32_0 = arith.constant 0 : i32
    return %arg0, %c0_i32 : i32, i32
  }
  func.func @transform_1(%arg0: i32) -> (i32, i32) {
    %c0_i32 = arith.constant 0 : i32
    %c0_i32_0 = arith.constant 0 : i32
    %c0_i32_1 = arith.constant 0 : i32
    return %c0_i32, %c0_i32_0 : i32, i32
  }
  func.func @transform_2(%arg0: i32) -> (i32, i32) {
    %c0_i32 = arith.constant 0 : i32
    %c0_i32_0 = arith.constant 0 : i32
    %c0_i32_1 = arith.constant 0 : i32
    return %c0_i32, %c0_i32_0 : i32, i32
  }
  func.func @transform_3(%arg0: i32) -> (i32, i32) {
    %c0_i32 = arith.constant 0 : i32
    %c0_i32_0 = arith.constant 0 : i32
    return %arg0, %c0_i32 : i32, i32
  }
}

</mosaic_0001>

<bundles_post_ra>
// kernel: tpu_custom_call.1
= control target key start
LH: loop header
LB: loop body
LE: loop exit
PB: predicated region body
PF: predicated region fallthrough
CT: control target
= control target key end

     0   :  { %v125_v29 = vlaneseq  ;;  %v788_v33 = vmov 1966171168   ;;  %s972_s0 = inlined_call_operand.vmem [shape: bf16[2,768], index: 0, kind: input, shape index: {}]   ;;  %s973_s1 = inlined_call_operand.vmem [shape: bf16[768,4], index: 1, kind: input, shape index: {}]   ;;  %s974_s2 = inlined_call_operand.vmem [shape: f32[1,4], index: 2, kind: input, shape index: {}]   ;;  %s975_s3 = inlined_call_operand.hbm [shape: f32[2,4], index: 3, kind: output, shape index: {}]  }
   0x1   :  { %v715_v0 = vld [vmem:[%s973_s1 + $0x40] sm:$0xff]   ;;  %v719_v4 = vld [vmem:[%s973_s1 + $0x48] sm:$0xff]   ;;  %v723_v8 = vld [vmem:[%s973_s1 + $0x50] sm:$0xff]   ;;  %v123_v34 = vunpack.c.l.s4 %v788_v33 }
   0x2   :  { %v716_v1 = vld [vmem:[%s973_s1] sm:$0xff]   ;;  %647 = vmatprep.subr.bf16.mxu0 %v715_v0  ;;  %v720_v5 = vld [vmem:[%s973_s1 + $0x8] sm:$0xff]   ;;  %v724_v9 = vld [vmem:[%s973_s1 + $0x10] sm:$0xff]   ;;  %v126_v35 = vshrl.u32 %v125_v29, 7 }
   0x3   :  { %v717_v2 = vld [vmem:[%s973_s1 + $0xc0] sm:$0xff]   ;;  %648 = vmatpush3.bf16.msra.mxu0 %v716_v1  ;;  %v721_v6 = vld [vmem:[%s973_s1 + $0xc8] sm:$0xff]   ;;  %v725_v10 = vld [vmem:[%s973_s1 + $0xd0] sm:$0xff]   ;;  %v124_v39 = vunpack.c.0.s8 %v123_v34 }
   0x4   :  { %v718_v3 = vld [vmem:[%s973_s1 + $0x80] sm:$0xff]   ;;  %669 = vmatprep.subr.bf16.mxu1 %v717_v2  ;;  %649 = vmatprep.subr.bf16.mxu0 %v719_v4  ;;  %v722_v7 = vld [vmem:[%s973_s1 + $0x88] sm:$0xff]   ;;  %v726_v11 = vld [vmem:[%s973_s1 + $0x90] sm:$0xff]  }
   0x5   :  { %670 = vmatpush3.bf16.msra.mxu1 %v718_v3  ;;  %v727_v12 = vld [vmem:[%s973_s1 + $0x58] sm:$0xff]   ;;  %v731_v16 = vld [vmem:[%s973_s1 + $0x60] sm:$0xff]   ;;  %v735_v20 = vld [vmem:[%s973_s1 + $0x68] sm:$0xff]   ;;  %v127_v40 = vsub.s32 %v124_v39, %v126_v35 }
   0x6   :  { %671 = vmatprep.subr.bf16.mxu1 %v721_v6  ;;  %v728_v13 = vld [vmem:[%s973_s1 + $0x18] sm:$0xff]   ;;  %v732_v17 = vld [vmem:[%s973_s1 + $0x20] sm:$0xff]   ;;  %v736_v21 = vld [vmem:[%s973_s1 + $0x28] sm:$0xff]  }
   0x7   :  { %650 = vmatpush3.bf16.msra.mxu0 %v720_v5  ;;  %v729_v14 = vld [vmem:[%s973_s1 + $0xd8] sm:$0xff]   ;;  %v733_v18 = vld [vmem:[%s973_s1 + $0xe0] sm:$0xff]   ;;  %v737_v22 = vld [vmem:[%s973_s1 + $0xe8] sm:$0xff]  }
   0x8   :  { %651 = vmatprep.subr.bf16.mxu0 %v723_v8  ;;  %v730_v15 = vld [vmem:[%s973_s1 + $0x98] sm:$0xff]   ;;  %v734_v19 = vld [vmem:[%s973_s1 + $0xa0] sm:$0xff]   ;;  %v738_v23 = vld [vmem:[%s973_s1 + $0xa8] sm:$0xff]  }
   0x9   :  { %672 = vmatpush3.bf16.msra.mxu1 %v722_v7  ;;  %v739_v24 = vld [vmem:[%s973_s1 + $0x70] sm:$0xff]   ;;  %v743_v28 = vld [vmem:[%s973_s1 + $0x78] sm:$0xff]   ;;  %v16_v32 = vld [vmem:[%s972_s0] sm:$0x3f] }
   0xa   :  { %673 = vmatprep.subr.bf16.mxu1 %v725_v10  ;;  %v740_v25 = vld [vmem:[%s973_s1 + $0x30] sm:$0xff]   ;;  %v744_v30 = vld [vmem:[%s973_s1 + $0x38] sm:$0xff]   ;;  %v748_v37 = vld [vmem:[%s973_s1 + $0x140] sm:$0xff]   ;;  %v121_v38 = vcombine.high %v16_v32, %v16_v32  ;;  %v128_v41 = vrot.slane %v16_v32, %v127_v40 }
   0xb   :  { %652 = vmatpush3.bf16.msra.mxu0 %v724_v9  ;;  %v741_v26 = vld [vmem:[%s973_s1 + $0xf0] sm:$0xff]   ;;  %v745_v31 = vld [vmem:[%s973_s1 + $0xf8] sm:$0xff]   ;;  %v749_v47 = vld [vmem:[%s973_s1 + $0x100] sm:$0xff]  }
   0xc   :  { %653 = vmatprep.subr.bf16.mxu0 %v727_v12  ;;  %v742_v27 = vld [vmem:[%s973_s1 + $0xb0] sm:$0xff]   ;;  %v747_v36 = vld [vmem:[%s973_s1 + $0xb8] sm:$0xff]   ;;  %v135_v42 = vrot.slane %v121_v38, %v127_v40  ;;  %v136_v43 = vcombine.high %v128_v41, %v128_v41  ;;  %v144_v44 = vrot.slane %v128_v41, %v127_v40  ;;  %v750_v49 = vld [vmem:[%s973_s1 + $0x148] sm:$0xff]  }
   0xd   :  { %674 = vmatpush3.bf16.msra.mxu1 %v726_v11  ;;  %v751_v52 = vld [vmem:[%s973_s1 + $0x108] sm:$0xff]   ;;  %v752_v53 = vld [vmem:[%s973_s1 + $0x150] sm:$0xff]  }
   0xe   :  { %675 = vmatprep.subr.bf16.mxu1 %v729_v14  ;;  %v137_v45 = vcombine.high %v135_v42, %v135_v42  ;;  %v158_v46 = vrot.slane %v136_v43, %v127_v40  ;;  %v166_v48 = vcombine.high %v144_v44, %v144_v44 }
   0xf   :  { %654 = vmatpush3.bf16.msra.mxu0 %v728_v13 }
  0x10   :  { %655 = vmatprep.subr.bf16.mxu0 %v731_v16  ;;  %494 = vmatprep.mubr.bf16.mxu0 %v158_v46  ;;  %v167_v50 = vcombine.high %v158_v46, %v158_v46  ;;  %v165_v51 = vrot.slane %v137_v45, %v127_v40 }
  0x11   :  { %676 = vmatpush3.bf16.msra.mxu1 %v730_v15 }
  0x12   :  { %677 = vmatprep.subr.bf16.mxu1 %v733_v18  ;;  %534 = vmatprep.mubr.bf16.mxu1 %v167_v50 }
  0x13   :  { %656 = vmatpush3.bf16.msra.mxu0 %v732_v17 }
  0x14   :  { %657 = vmatprep.subr.bf16.mxu0 %v735_v20 }
  0x15   :  { %678 = vmatpush3.bf16.msra.mxu1 %v734_v19 }
  0x16   :  { %679 = vmatprep.subr.bf16.mxu1 %v737_v22 }
  0x17   :  { %658 = vmatpush3.bf16.msra.mxu0 %v736_v21 }
  0x18   :  { %659 = vmatprep.subr.bf16.mxu0 %v739_v24 }
  0x19   :  { %680 = vmatpush3.bf16.msra.mxu1 %v738_v23 }
  0x1a   :  { %681 = vmatprep.subr.bf16.mxu1 %v741_v26 }
  0x1b   :  { %660 = vmatpush3.bf16.msra.mxu0 %v740_v25 }
  0x1c   :  { %661 = vmatprep.subr.bf16.mxu0 %v743_v28 }
  0x1d   :  { %682 = vmatpush3.bf16.msra.mxu1 %v742_v27 }
  0x1e   :  { %683 = vmatprep.subr.bf16.mxu1 %v745_v31 }
  0x1f   :  { %662 = vmatpush3.bf16.msra.mxu0 %v744_v30 }
  0x20   :  { %691 = vmatprep.subr.bf16.mxu0 %v748_v37 }
  0x21   :  { %684 = vmatpush3.bf16.msra.mxu1 %v747_v36 }
  0x22   :  { %495 = vmatmul.mubr.bf16.vlgmr.msra.gmra.mrb[0].mxu0 %v144_v44 }
  0x23   :  { %692 = vmatpush3.bf16.msra.mxu0 %v749_v47  ;;  %574 = vmatprep.mubr.bf16.mxu0 %v165_v51 }
  0x24   :  { %535 = vmatmul.mubr.bf16.vlgmr.msra.gmra.mrb[0].mxu1 %v166_v48  ;;  %693 = vmatprep.subr.bf16.mxu0 %v750_v49 }
  0x25   :  { %8 = vsyncpa [#allocation3], 0  ;;  %v753_v54 = vld [vmem:[%s973_s1 + $0x110] sm:$0xff]   ;;  %v754_v55 = vld [vmem:[%s973_s1 + $0x158] sm:$0xff]   ;;  %v151_v1 = vrot.slane %v135_v42, %v127_v40  ;;  %vm582_vm0 = vcmask 25600  }
  0x26   :  { %v755_v56 = vld [vmem:[%s973_s1 + $0x118] sm:$0xff]   ;;  %v756_v57 = vld [vmem:[%s973_s1 + $0x160] sm:$0xff]   ;;  %v758_v59 = vld [vmem:[%s973_s1 + $0x168] sm:$0xff]  }
  0x27   :  { %694 = vmatpush3.bf16.msra.mxu0 %v751_v52  ;;  %v757_v58 = vld [vmem:[%s973_s1 + $0x120] sm:$0xff]   ;;  %v759_v60 = vld [vmem:[%s973_s1 + $0x128] sm:$0xff]   ;;  %v760_v61 = vld [vmem:[%s973_s1 + $0x170] sm:$0xff]  }
  0x28   :  { %695 = vmatprep.subr.bf16.mxu0 %v752_v53  ;;  %v761_v62 = vld [vmem:[%s973_s1 + $0x130] sm:$0xff]   ;;  %v762_v63 = vld [vmem:[%s973_s1 + $0x178] sm:$0xff]   ;;  %v598_v3 = vld [vmem:[%s974_s2] ss:$0 sm:$0xff] }
  0x29   :  { %v763_v0 = vld [vmem:[%s973_s1 + $0x138] sm:$0xff]   ;;  %s789_s1 = smov [#allocation2]  }
  0x2a   :  { %s590_s29 = sshll.u32 %s789_s1, 4  ;;  %s591_s29 = int_to_ptr.vmem [resolvable:$true] %s590_s29 }
  0x2b   :  { %696 = vmatpush3.bf16.msra.mxu0 %v753_v54  ;;  %s764_s2 = scalar_lea.vmem %s591_s29, 32  ;;  %p769_p1 = scmp.lt.s32.totalorder %s591_s29, %s591_s29 }
  0x2c   :  { %697 = vmatprep.subr.bf16.mxu0 %v754_v55  ;;  %p765_p0 = scmp.ne.s32.totalorder %s591_s29, %s764_s2  ;;  %p770_p2 = scmp.lt.s32.totalorder %s764_s2, %s764_s2 }
  0x2e   :  { %p771_p3 = por %p770_p2, %p769_p1 }
  0x2f   :  { %698 = vmatpush3.bf16.msra.mxu0 %v755_v56 }
  0x30   :  { %699 = vmatprep.subr.bf16.mxu0 %v756_v57  ;;  %p772_p4 = pnand %p771_p3, %p765_p0 }
  0x33   :  { %700 = vmatpush3.bf16.msra.mxu0 %v757_v58 }
  0x34   :  { %701 = vmatprep.subr.bf16.mxu0 %v758_v59 }
  0x37   :  { %702 = vmatpush3.bf16.msra.mxu0 %v759_v60 }
  0x38   :  { %703 = vmatprep.subr.bf16.mxu0 %v760_v61 }
  0x3b   :  { %704 = vmatpush3.bf16.msra.mxu0 %v761_v62 }
  0x3c   :  { %705 = vmatprep.subr.bf16.mxu0 %v762_v63 }
  0x3f   :  { %706 = vmatpush3.bf16.msra.mxu0 %v763_v0 }
  0x42   :  { %575 = vmatmul.mubr.bf16.vlgmr.msra.gmra.mrb[4].mxu0 %v151_v1 }
  0xf5   :  { %v663_v2 = vpop.f32.mrb[0].mxu0 }
  0xf6   :  { %v664_v4 = vpop.f32.mrb[1].mxu0 }
  0xf7   :  { %v665_v5 = vadd.f32 %v664_v4, %v663_v2  ;;  %v666_v6 = vpop.f32.mrb[2].mxu0  ;;  %v685_v7 = vpop.f32.mrb[0].mxu1 }
  0xf8   :  { %v667_v8 = vpop.f32.mrb[3].mxu0  ;;  %v686_v9 = vpop.f32.mrb[1].mxu1 }
  0xf9   :  { %v497_v10 = vadd.f32 %v665_v5, %v598_v3  ;;  %v687_v11 = vadd.f32 %v686_v9, %v685_v7  ;;  %v688_v12 = vpop.f32.mrb[2].mxu1 }
  0xfa   :  { %v689_v13 = vpop.f32.mrb[3].mxu1 }
  0xfb   :  { %v537_v14 = vadd.f32 %v687_v11, %v497_v10 }
 0x115   :  { %v707_v15 = vpop.f32.mrb[4].mxu0 }
 0x116   :  { %v708_v16 = vpop.f32.mrb[5].mxu0 }
 0x117   :  { %v709_v17 = vadd.f32 %v708_v16, %v707_v15  ;;  %v710_v18 = vpop.f32.mrb[6].mxu0 }
 0x118   :  { %v711_v19 = vpop.f32.mrb[7].mxu0 }
 0x119   :  { %v577_v20 = vadd.f32 %v709_v17, %v537_v14 }
 0x11b   :  { %583 = vst.msk [vmem:[#allocation2] sm:$0x3] %vm582_vm0, %v577_v20 }
 0x11c   :  { %775 = shalt.err (!%p772_p4)
}
 0x11d   :  { %s776_s5 = scalar_lea.hbm %s975_s3, 32 }
 0x11e   :  { %p777_p5 = scmp.ne.s32.totalorder %s975_s3, %s776_s5  ;;  %p780_p6 = scmp.lt.u32.totalorder %s776_s5, %s975_s3 }
 0x120   :  { %p782_p7 = pnand %p780_p6, %p777_p5 }
 0x122   :  { %785 = shalt.err (!%p782_p7)
}
 0x123   :  { %593 = dma.vmem_to_hbm [thread:$0]  %s591_s29, 32, %s975_s3, [#allocation3]  }
 0x124   :  { %786 = dma.done.wait [#allocation3], 32  }
 0x125   :  { %787 = vsyncadd [#allocation3], 4294967264 }
 0x126   :  { %597 = vsyncpa [#allocation3], 1 }

</bundles_post_ra>
